<compile_context>
chip_gen: v7x
topology: tpu7x:2x2x1
jax: 0.10.0
libtpu: 0.0.40
codegen_flags: <defaults>
</compile_context>

<pallas_src>
import functools

import jax
import jax.numpy as jnp
from jax.experimental import pallas as pl
from jax.experimental.pallas import tpu as pltpu

_MAX_TILE = 4096  # rows per grid step; ~3 MiB of VMEM at latent=32/units=64


def _odefunc_kernel(y_ref, w1_ref, b1_ref, w2_ref, b2_ref, w3_ref, b3_ref,
                    out_ref, *, negate):
    """Fused MLP: out = +/-(tanh(tanh(y@W1+b1)@W2+b2)@W3 + b3), all f32."""
    y = y_ref[...]
    h1 = jnp.tanh(
        jnp.dot(y, w1_ref[...], preferred_element_type=jnp.float32)
        + b1_ref[...])
    h2 = jnp.tanh(
        jnp.dot(h1, w2_ref[...], preferred_element_type=jnp.float32)
        + b2_ref[...])
    out = (jnp.dot(h2, w3_ref[...], preferred_element_type=jnp.float32)
           + b3_ref[...])
    if negate:  # static Python flag -> folded into the kernel, no extra XLA op
        out = -out
    out_ref[...] = out.astype(out_ref.dtype)


def _choose_batch_tiling(batch):
    """Pick (tile_rows, n_steps, padded_rows).

    Tile is a multiple of 8 (f32 sublane).  The step count is derived first
    (cdiv(batch, _MAX_TILE)), then the tile from the step count, so padding
    waste is bounded by ~8 rows per step instead of up to a full tile.  No
    forced multi-step split for small batches: on single-TC v5e/v6e the grid
    is a serial loop, so extra steps are pure overhead; batches large enough
    to need >1 step still shard across v7x's two TCs via "parallel".
    """
    padded8 = ((batch + 7) // 8) * 8
    n_steps = -(-padded8 // _MAX_TILE)                # ceil div
    tb = ((-(-padded8 // n_steps) + 7) // 8) * 8      # round_up(ceil, 8)
    padded = n_steps * tb
    return tb, n_steps, padded


@functools.partial(jax.jit, static_argnames=("backwards",))
def ode_func_forward(t_local, y, params, backwards=False):
    """ODEFunc.forward: dy/dt at (t_local, y).

    t_local is unused (matches the PyTorch module: gradient_net ignores t).
    y: (..., latent_dim) f32.  Leading dims (e.g. (num_stages, batch)) are
    flattened so multiple solver-stage evaluations fuse into one pallas_call.
    params: w1/w2/w3 f32 (in_features, out_features); b1/b2/b3 f32 (1, out).
    """
    del t_local  # gradient_net ignores t, exactly as in get_ode_gradient_nn
    orig_shape = y.shape
    latent_dim = orig_shape[-1]
    y2 = y.reshape(-1, latent_dim)
    batch = y2.shape[0]
    n_units = params["w1"].shape[1]

    tb, n_steps, padded = _choose_batch_tiling(batch)
    # Zero-copy path when the batch is already tile-aligned (common when the
    # solver stacks stages / uses power-of-two batches).
    y_in = y2 if padded == batch else jnp.pad(y2, ((0, padded - batch), (0, 0)))

    flops_per_row = 2 * (latent_dim * n_units + n_units * n_units
                         + n_units * latent_dim)
    cost = pl.CostEstimate(
        flops=padded * flops_per_row,
        transcendentals=padded * 2 * n_units,               # two tanh layers
        bytes_accessed=4 * (padded * 2 * latent_dim
                            + latent_dim * n_units + n_units * n_units
                            + n_units * latent_dim + 2 * n_units + latent_dim),
    )

    # Weights/biases: constant index_map -> fetched once, VMEM-resident
    # across all batch tiles.
    full = lambda shape: pl.BlockSpec(shape, lambda i: (0, 0))
    kernel = functools.partial(_odefunc_kernel, negate=bool(backwards))

    out = pl.pallas_call(
        kernel,
        out_shape=jax.ShapeDtypeStruct((padded, latent_dim), y.dtype),
        grid_spec=pltpu.PrefetchScalarGridSpec(
            num_scalar_prefetch=0,
            grid=(n_steps,),
            in_specs=[
                pl.BlockSpec((tb, latent_dim), lambda i: (i, 0)),   # y tile
                full((latent_dim, n_units)),                        # w1
                full((1, n_units)),                                 # b1
                full((n_units, n_units)),                           # w2
                full((1, n_units)),                                 # b2
                full((n_units, latent_dim)),                        # w3
                full((1, latent_dim)),                              # b3
            ],
            out_specs=pl.BlockSpec((tb, latent_dim), lambda i: (i, 0)),
        ),
        compiler_params=pltpu.CompilerParams(
            dimension_semantics=("parallel",),
            vmem_limit_bytes=32 << 20),
        cost_estimate=cost,
    )(y_in, params["w1"], params["b1"], params["w2"], params["b2"],
      params["w3"], params["b3"])

    out = out if padded == batch else out[:batch]
    return out.reshape(orig_shape)


def init_ode_func_params(key, latent_dim, n_units):
    """Mirrors utils.init_network_weights: weight ~ N(0, 0.1), bias = 0.
    Weights stored (in_features, out_features), all f32."""
    k1, k2, k3 = jax.random.split(key, 3)
    std = 0.1
    w = lambda k, s: std * jax.random.normal(k, s, jnp.float32)
    return {
        "w1": w(k1, (latent_dim, n_units)),
        "b1": jnp.zeros((1, n_units), jnp.float32),
        "w2": w(k2, (n_units, n_units)),
        "b2": jnp.zeros((1, n_units), jnp.float32),
        "w3": w(k3, (n_units, latent_dim)),
        "b3": jnp.zeros((1, latent_dim), jnp.float32),
    }


def _reference_forward(t_local, y, params, backwards=False):
    """Pure-JAX f32 reference of gradient_net(y)."""
    del t_local
    h1 = jnp.tanh(y @ params["w1"] + params["b1"])
    h2 = jnp.tanh(h1 @ params["w2"] + params["b2"])
    out = h2 @ params["w3"] + params["b3"]
    return -out if backwards else out


if __name__ == "__main__":
    key = jax.random.PRNGKey(0)
    k_params, k_y, k_stage = jax.random.split(key, 3)

    batch = 8
    latent_dim = 32   # ODE latent state dimensionality
    n_units = 64      # hidden units of the ode_func_net MLP
    num_stages = 4    # e.g. RK4 stage evaluations fused into one call

    params = init_ode_func_params(k_params, latent_dim, n_units)
    y = jax.random.normal(k_y, (batch, latent_dim), jnp.float32)
    t_local = jnp.float32(0.5)  # unused by gradient_net, kept for API parity

    # Forward.
    grad = jax.block_until_ready(
        ode_func_forward(t_local, y, params, backwards=False))
    ref = _reference_forward(t_local, y, params, backwards=False)
    assert grad.shape == (batch, latent_dim)
    assert jnp.allclose(grad, ref, atol=1e-5, rtol=1e-5), (
        float(jnp.max(jnp.abs(grad - ref))))

    # backwards=True: sign flip fused inside the kernel.
    grad_bw = jax.block_until_ready(
        ode_func_forward(t_local, y, params, backwards=True))
    assert jnp.allclose(grad_bw, -ref, atol=1e-5, rtol=1e-5)

    # Fused solver-stage evaluation: (num_stages, batch, latent) in ONE
    # pallas_call (stages flattened into the batch axis, weights DMA'd once).
    y_stages = jax.random.normal(
        k_stage, (num_stages, batch, latent_dim), jnp.float32)
    grad_stages = jax.block_until_ready(
        ode_func_forward(t_local, y_stages, params, backwards=False))
    ref_stages = _reference_forward(t_local, y_stages, params)
    assert grad_stages.shape == (num_stages, batch, latent_dim)
    assert jnp.allclose(grad_stages, ref_stages, atol=1e-5, rtol=1e-5)

    # Ragged (non multiple-of-8) batch exercises the pad/slice fallback path.
    y_ragged = jax.random.normal(k_y, (20, latent_dim), jnp.float32)
    grad_ragged = jax.block_until_ready(
        ode_func_forward(t_local, y_ragged, params, backwards=False))
    assert jnp.allclose(grad_ragged,
                        _reference_forward(t_local, y_ragged, params),
                        atol=1e-5, rtol=1e-5)

    print("KERNEL_OK")
</pallas_src>

<mosaic_0001>
module attributes {stable_mosaic.version = 11 : i64} {
  func.func @_odefunc_kernel(%arg0: i32, %arg1: memref<8x32xf32, #tpu.memory_space<vmem>>, %arg2: memref<32x64xf32, #tpu.memory_space<vmem>>, %arg3: memref<1x64xf32, #tpu.memory_space<vmem>>, %arg4: memref<64x64xf32, #tpu.memory_space<vmem>>, %arg5: memref<1x64xf32, #tpu.memory_space<vmem>>, %arg6: memref<64x32xf32, #tpu.memory_space<vmem>>, %arg7: memref<1x32xf32, #tpu.memory_space<vmem>>, %arg8: memref<8x32xf32, #tpu.memory_space<vmem>>) attributes {dimension_semantics = [#tpu.dimension_semantics<parallel>], iteration_bounds = array<i64: 1>, scalar_prefetch = 0 : i64, scratch_operands = 0 : i64, tpu.core_type = #tpu.core_type<tc>, window_params = [{transform_indices = @transform_0, window_bounds = array<i64: 8, 32>}, {pipeline_mode = #tpu.pipeline_mode<synchronous>, transform_indices = @transform_1, window_bounds = array<i64: 32, 64>}, {pipeline_mode = #tpu.pipeline_mode<synchronous>, transform_indices = @transform_2, window_bounds = array<i64: 1, 64>}, {pipeline_mode = #tpu.pipeline_mode<synchronous>, transform_indices = @transform_3, window_bounds = array<i64: 64, 64>}, {pipeline_mode = #tpu.pipeline_mode<synchronous>, transform_indices = @transform_4, window_bounds = array<i64: 1, 64>}, {pipeline_mode = #tpu.pipeline_mode<synchronous>, transform_indices = @transform_5, window_bounds = array<i64: 64, 32>}, {pipeline_mode = #tpu.pipeline_mode<synchronous>, transform_indices = @transform_6, window_bounds = array<i64: 1, 32>}, {transform_indices = @transform_7, window_bounds = array<i64: 8, 32>}]} {
    %c0 = arith.constant 0 : index
    %c0_0 = arith.constant 0 : index
    %0 = vector.load %arg1[%c0, %c0_0] : memref<8x32xf32, #tpu.memory_space<vmem>>, vector<8x32xf32>
    %c0_1 = arith.constant 0 : index
    %c0_2 = arith.constant 0 : index
    %1 = vector.load %arg2[%c0_1, %c0_2] : memref<32x64xf32, #tpu.memory_space<vmem>>, vector<32x64xf32>
    %cst = arith.constant dense<0.000000e+00> : vector<8x64xf32>
    %2 = tpu.matmul %0, %1, %cst {dimension_numbers = #tpu.dot_dimension_numbers<[1], [0], [0], [1], [0, 0, 1, 1], [], []>} : vector<8x32xf32>, vector<32x64xf32>, vector<8x64xf32> -> vector<8x64xf32>
    %c0_3 = arith.constant 0 : index
    %c0_4 = arith.constant 0 : index
    %3 = vector.load %arg3[%c0_3, %c0_4] : memref<1x64xf32, #tpu.memory_space<vmem>>, vector<1x64xf32>
    %4 = vector.broadcast %3 : vector<1x64xf32> to vector<8x64xf32>
    %5 = arith.addf %2, %4 : vector<8x64xf32>
    %6 = math.tanh %5 : vector<8x64xf32>
    %c0_5 = arith.constant 0 : index
    %c0_6 = arith.constant 0 : index
    %7 = vector.load %arg4[%c0_5, %c0_6] : memref<64x64xf32, #tpu.memory_space<vmem>>, vector<64x64xf32>
    %cst_7 = arith.constant dense<0.000000e+00> : vector<8x64xf32>
    %8 = tpu.matmul %6, %7, %cst_7 {dimension_numbers = #tpu.dot_dimension_numbers<[1], [0], [0], [1], [0, 0, 1, 1], [], []>} : vector<8x64xf32>, vector<64x64xf32>, vector<8x64xf32> -> vector<8x64xf32>
    %c0_8 = arith.constant 0 : index
    %c0_9 = arith.constant 0 : index
    %9 = vector.load %arg5[%c0_8, %c0_9] : memref<1x64xf32, #tpu.memory_space<vmem>>, vector<1x64xf32>
    %10 = vector.broadcast %9 : vector<1x64xf32> to vector<8x64xf32>
    %11 = arith.addf %8, %10 : vector<8x64xf32>
    %12 = math.tanh %11 : vector<8x64xf32>
    %c0_10 = arith.constant 0 : index
    %c0_11 = arith.constant 0 : index
    %13 = vector.load %arg6[%c0_10, %c0_11] : memref<64x32xf32, #tpu.memory_space<vmem>>, vector<64x32xf32>
    %cst_12 = arith.constant dense<0.000000e+00> : vector<8x32xf32>
    %14 = tpu.matmul %12, %13, %cst_12 {dimension_numbers = #tpu.dot_dimension_numbers<[1], [0], [0], [1], [0, 0, 1, 1], [], []>} : vector<8x64xf32>, vector<64x32xf32>, vector<8x32xf32> -> vector<8x32xf32>
    %c0_13 = arith.constant 0 : index
    %c0_14 = arith.constant 0 : index
    %15 = vector.load %arg7[%c0_13, %c0_14] : memref<1x32xf32, #tpu.memory_space<vmem>>, vector<1x32xf32>
    %16 = vector.broadcast %15 : vector<1x32xf32> to vector<8x32xf32>
    %17 = arith.addf %14, %16 : vector<8x32xf32>
    %c0_15 = arith.constant 0 : index
    %c0_16 = arith.constant 0 : index
    %18 = vector.load %arg8[%c0_15, %c0_16] : memref<8x32xf32, #tpu.memory_space<vmem>>, vector<8x32xf32>
    tpu.vector_store %arg8[%c0_15, %c0_16], %17 {strides = array<i32>} : memref<8x32xf32, #tpu.memory_space<vmem>>, vector<8x32xf32>,
    return
  }
  func.func @transform_0(%arg0: i32) -> (i32, i32) {
    %c0_i32 = arith.constant 0 : i32
    %c0_i32_0 = arith.constant 0 : i32
    return %arg0, %c0_i32 : i32, i32
  }
  func.func @transform_1(%arg0: i32) -> (i32, i32) {
    %c0_i32 = arith.constant 0 : i32
    %c0_i32_0 = arith.constant 0 : i32
    %c0_i32_1 = arith.constant 0 : i32
    return %c0_i32, %c0_i32_0 : i32, i32
  }
  func.func @transform_2(%arg0: i32) -> (i32, i32) {
    %c0_i32 = arith.constant 0 : i32
    %c0_i32_0 = arith.constant 0 : i32
    %c0_i32_1 = arith.constant 0 : i32
    return %c0_i32, %c0_i32_0 : i32, i32
  }
  func.func @transform_3(%arg0: i32) -> (i32, i32) {
    %c0_i32 = arith.constant 0 : i32
    %c0_i32_0 = arith.constant 0 : i32
    %c0_i32_1 = arith.constant 0 : i32
    return %c0_i32, %c0_i32_0 : i32, i32
  }
  func.func @transform_4(%arg0: i32) -> (i32, i32) {
    %c0_i32 = arith.constant 0 : i32
    %c0_i32_0 = arith.constant 0 : i32
    %c0_i32_1 = arith.constant 0 : i32
    return %c0_i32, %c0_i32_0 : i32, i32
  }
  func.func @transform_5(%arg0: i32) -> (i32, i32) {
    %c0_i32 = arith.constant 0 : i32
    %c0_i32_0 = arith.constant 0 : i32
    %c0_i32_1 = arith.constant 0 : i32
    return %c0_i32, %c0_i32_0 : i32, i32
  }
  func.func @transform_6(%arg0: i32) -> (i32, i32) {
    %c0_i32 = arith.constant 0 : i32
    %c0_i32_0 = arith.constant 0 : i32
    %c0_i32_1 = arith.constant 0 : i32
    return %c0_i32, %c0_i32_0 : i32, i32
  }
  func.func @transform_7(%arg0: i32) -> (i32, i32) {
    %c0_i32 = arith.constant 0 : i32
    %c0_i32_0 = arith.constant 0 : i32
    return %arg0, %c0_i32 : i32, i32
  }
}

</mosaic_0001>

<bundles_post_ra>
// kernel: ode_func_forward.1
= control target key start
LH: loop header
LB: loop body
LE: loop exit
PB: predicated region body
PF: predicated region fallthrough
CT: control target
= control target key end

     0   :  { %v447_v3 = vmov 0.0|0.0   ;;  %vm448_vm0 = vmmov 0   ;;  %v449_v6 = vmov 0.0   ;;  %s592_s0 = inlined_call_operand.vmem [shape: f32[8,32], index: 0, kind: input, shape index: {}]   ;;  %s593_s1 = inlined_call_operand.vmem [shape: f32[32,64], index: 1, kind: input, shape index: {}]   ;;  %s594_s2 = inlined_call_operand.vmem [shape: f32[1,64], index: 2, kind: input, shape index: {}]   ;;  %s595_s3 = inlined_call_operand.vmem [shape: f32[64,64], index: 3, kind: input, shape index: {}]   ;;  %s596_s4 = inlined_call_operand.vmem [shape: f32[1,64], index: 4, kind: input, shape index: {}]   ;;  %s597_s5 = inlined_call_operand.vmem [shape: f32[64,32], index: 5, kind: input, shape index: {}]   ;;  %s598_s6 = inlined_call_operand.vmem [shape: f32[1,32], index: 6, kind: input, shape index: {}]   ;;  %s599_s7 = inlined_call_operand.hbm [shape: f32[8,32], index: 7, kind: output, shape index: {}]  }
   0x1   :  { %v28_v0 = vld [vmem:[%s593_s1] sm:$0xff]  ;;  %v29_v1 = vld [vmem:[%s593_s1 + $0x8] sm:$0xff]  ;;  %v30_v2 = vld [vmem:[%s593_s1 + $0x10] sm:$0xff]  ;;  %385 = vmatprep.subr.bf16.mxu0 %v447_v3  ;;  %344 = vmatprep.mubr.msk.f32.mxu0 %vm448_vm0, %v449_v6 }
   0x2   :  { %v386_v4 = vpack.c.bf16 %v29_v1, %v28_v0  ;;  %v31_v5 = vld [vmem:[%s593_s1 + $0x18] sm:$0xff]  ;;  %v114_v7 = vld [vmem:[%s595_s3] sm:$0xff]  ;;  %391 = vmatprep.subr.bf16.mxu1 %v447_v3  ;;  %v115_v8 = vld [vmem:[%s595_s3 + $0x8] sm:$0xff]  ;;  %363 = vmatprep.mubr.msk.f32.mxu1 %vm448_vm0, %v449_v6 }
   0x3   :  { %12 = vsyncpa [#allocation3], 0  ;;  %v389_v9 = vpack.c.bf16 %v31_v5, %v30_v2  ;;  %v392_v10 = vpack.c.bf16 %v115_v8, %v114_v7  ;;  %v27_v11 = vld [vmem:[%s592_s0] sm:$0xff]  ;;  %vm39_vm1 = vcmask 261120   ;;  %v116_v12 = vld [vmem:[%s595_s3 + $0x10] sm:$0xff]  ;;  %vm129_vm2 = vcmask 523264  }
   0x4   :  { %387 = vmatpush3.bf16.msra.mxu0 %v386_v4  ;;  %v117_v13 = vld [vmem:[%s595_s3 + $0x18] sm:$0xff]  ;;  %v118_v15 = vld [vmem:[%s595_s3 + $0x20] sm:$0xff]  ;;  %v119_v16 = vld [vmem:[%s595_s3 + $0x28] sm:$0xff] }
   0x5   :  { %388 = vmatprep.subr.bf16.mxu0 %v447_v3  ;;  %393 = vmatpush3.bf16.msra.mxu1 %v392_v10  ;;  %v395_v14 = vpack.c.bf16 %v117_v13, %v116_v12  ;;  %v398_v17 = vpack.c.bf16 %v119_v16, %v118_v15  ;;  %v120_v18 = vld [vmem:[%s595_s3 + $0x30] sm:$0xff]  ;;  %v121_v19 = vld [vmem:[%s595_s3 + $0x38] sm:$0xff]  ;;  %v204_v21 = vld [vmem:[%s597_s5] sm:$0xff] }
   0x6   :  { %394 = vmatprep.subr.bf16.mxu1 %v447_v3  ;;  %v401_v20 = vpack.c.bf16 %v121_v19, %v120_v18  ;;  %v205_v22 = vld [vmem:[%s597_s5 + $0x8] sm:$0xff]  ;;  %v307_v24 = vld [vmem:[%s594_s2] ss:$0 sm:$0xff]  ;;  %v206_v29 = vld [vmem:[%s597_s5 + $0x10] sm:$0xff] }
   0x7   :  { %v404_v23 = vpack.c.bf16 %v205_v22, %v204_v21  ;;  %v207_v30 = vld [vmem:[%s597_s5 + $0x18] sm:$0xff]  ;;  %v208_v32 = vld [vmem:[%s597_s5 + $0x20] sm:$0xff]  ;;  %v209_v33 = vld [vmem:[%s597_s5 + $0x28] sm:$0xff] }
   0x8   :  { %390 = vmatpush3.bf16.msra.mxu0 %v389_v9  ;;  %v407_v31 = vpack.c.bf16 %v207_v30, %v206_v29  ;;  %v410_v34 = vpack.c.bf16 %v209_v33, %v208_v32  ;;  %v210_v35 = vld [vmem:[%s597_s5 + $0x30] sm:$0xff]  ;;  %v211_v36 = vld [vmem:[%s597_s5 + $0x38] sm:$0xff]  ;;  %v309_v38 = vld [vmem:[%s596_s4] ss:$0 sm:$0xff]  ;;  %s450_s5 = smov [#allocation2]  }
   0x9   :  { %403 = vmatprep.subr.bf16.mxu0 %v447_v3  ;;  %396 = vmatpush3.bf16.msra.mxu1 %v395_v14  ;;  %v413_v37 = vpack.c.bf16 %v211_v36, %v210_v35  ;;  %v311_v43 = vld [vmem:[%s598_s6] ss:$0 sm:$0xff]  ;;  %s299_s20 = sshll.u32 %s450_s5, 4  ;;  %s300_s20 = int_to_ptr.vmem [resolvable:$true] %s299_s20 }
   0xa   :  { %397 = vmatprep.subr.bf16.mxu1 %v447_v3  ;;  %s423_s4 = scalar_lea.vmem %s300_s20, 128  ;;  %p428_p1 = scmp.lt.s32.totalorder %s300_s20, %s300_s20 }
   0xb   :  { %345 = vmatmul.mubr.msk.f32.vlgmr.msra.gmra.mrb[0].mxu0 %vm39_vm1, %v27_v11  ;;  %p424_p0 = scmp.ne.s32.totalorder %s300_s20, %s423_s4  ;;  %p429_p2 = scmp.lt.s32.totalorder %s423_s4, %s423_s4 }
   0xc   :  { %382 = vmatprep.mubr.msk.f32.mxu0 %vm448_vm0, %v449_v6  ;;  %405 = vmatpush3.bf16.msra.mxu0 %v404_v23 }
   0xd   :  { %399 = vmatpush3.bf16.msra.mxu1 %v398_v17  ;;  %406 = vmatprep.subr.bf16.mxu0 %v447_v3  ;;  %p430_p3 = por %p429_p2, %p428_p1 }
   0xe   :  { %400 = vmatprep.subr.bf16.mxu1 %v447_v3 }
   0xf   :  { %p431_p4 = pnand %p430_p3, %p424_p0 }
  0x10   :  { %408 = vmatpush3.bf16.msra.mxu0 %v407_v31 }
  0x11   :  { %402 = vmatpush3.bf16.msra.mxu1 %v401_v20  ;;  %409 = vmatprep.subr.bf16.mxu0 %v447_v3 }
  0x14   :  { %411 = vmatpush3.bf16.msra.mxu0 %v410_v34 }
  0x15   :  { %412 = vmatprep.subr.bf16.mxu0 %v447_v3 }
  0x18   :  { %414 = vmatpush3.bf16.msra.mxu0 %v413_v37 }
  0xde   :  { %v109_v25 = vpop.f32.mrb[0].mxu0 }
  0xdf   :  { %v110_v26 = vadd.f32 %v307_v24, %v109_v25  ;;  %v346_v27 = vpop.f32.mrb[1].mxu0 }
  0xe1   :  { %419 = vtanh.f32 %v110_v26 }
  0xeb   :  { %v420_v28 = vpop.eup %419 }
  0xec   :  { %364 = vmatmul.mubr.msk.f32.vlgmr.msra.gmra.mrb[0].mxu1 %vm129_vm2, %v420_v28 }
 0x1bf   :  { %v199_v39 = vpop.f32.mrb[0].mxu1 }
 0x1c0   :  { %v200_v40 = vadd.f32 %v309_v38, %v199_v39  ;;  %v365_v41 = vpop.f32.mrb[1].mxu1 }
 0x1c2   :  { %421 = vtanh.f32 %v200_v40 }
 0x1cc   :  { %v422_v42 = vpop.eup %421 }
 0x1cd   :  { %383 = vmatmul.mubr.msk.f32.vlgmr.msra.gmra.mrb[2].mxu0 %vm129_vm2, %v422_v42 }
 0x2a0   :  { %v288_v44 = vpop.f32.mrb[2].mxu0 }
 0x2a1   :  { %v289_v45 = vadd.f32 %v311_v43, %v288_v44  ;;  %v384_v46 = vpop.f32.mrb[3].mxu0 }
 0x2a3   :  { %292 = vst.msk [vmem:[#allocation2] sm:$0xff] %vm39_vm1, %v289_v45 }
 0x2a4   :  { %434 = shalt.err (!%p431_p4)
}
 0x2a5   :  { %s435_s23 = scalar_lea.hbm %s599_s7, 128 }
 0x2a6   :  { %p436_p5 = scmp.ne.s32.totalorder %s599_s7, %s435_s23  ;;  %p439_p6 = scmp.lt.u32.totalorder %s435_s23, %s599_s7 }
 0x2a8   :  { %p441_p7 = pnand %p439_p6, %p436_p5 }
 0x2aa   :  { %444 = shalt.err (!%p441_p7)
}
 0x2ab   :  { %302 = dma.vmem_to_hbm [thread:$0]  %s300_s20, 128, %s599_s7, [#allocation3]  }
 0x2ac   :  { %445 = dma.done.wait [#allocation3], 128  }
 0x2ad   :  { %446 = vsyncadd [#allocation3], 4294967168 }
 0x2ae   :  { %306 = vsyncpa [#allocation3], 1 }

</bundles_post_ra>
